<compile_context>
chip_gen: v7x
topology: tpu7x:2x2x1
jax: 0.10.0
libtpu: 0.0.40
codegen_flags: <defaults>
</compile_context>

<pallas_src>
import functools

import jax
import jax.numpy as jnp
from jax.experimental import pallas as pl
from jax.experimental.pallas import tpu as pltpu


def _costum_loss_kernel(logits_ref, tgt_ref, out_ref, *, n_rows, tile_n):
    # logits_ref: [TILE_N, C] (native dtype), tgt_ref: [TILE_N, 1] int32
    # out_ref:    [1, 1, 128] f32 -- per-tile partial sum of (lse - picked), lane-broadcast
    i = pl.program_id(0)

    x = logits_ref[...].astype(jnp.float32)                            # [TILE_N, C]
    tgt = tgt_ref[...]                                                 # [TILE_N, 1]

    # numerically-stable log-softmax denominator per row
    m = jnp.max(x, axis=-1, keepdims=True)                             # [TILE_N, 1]
    lse = m + jnp.log(jnp.sum(jnp.exp(x - m), axis=-1, keepdims=True)) # [TILE_N, 1]

    # gather logit at target index via one-hot (lane iota == target)
    classes = jax.lax.broadcasted_iota(jnp.int32, x.shape, 1)          # [TILE_N, C]
    onehot = (classes == tgt).astype(jnp.float32)                      # [TILE_N, C]
    picked = jnp.sum(x * onehot, axis=-1, keepdims=True)               # [TILE_N, 1]

    # mask rows of the ragged last tile (OOB rows contain undefined data)
    row_ids = i * tile_n + jax.lax.broadcasted_iota(jnp.int32, (tile_n, 1), 0)
    valid = row_ids < n_rows                                           # [TILE_N, 1]
    contrib = jnp.where(valid, lse - picked, jnp.float32(0.0))         # [TILE_N, 1]

    partial = jnp.sum(contrib)                                         # scalar f32
    out_ref[...] = jnp.broadcast_to(partial, (1, 1, 128)).astype(out_ref.dtype)


def costum_loss(out_logits, ce_target, regularization, gamma):
    """Equivalent of CostumLoss.forward(out, ce_target, regularization, device).

    out_logits:     [N, C] float (any float dtype; NOT up-cast in the wrapper)
    ce_target:      [N]    int   (class indices)
    regularization: scalar float
    gamma:          scalar float parameter (torch init: 0.01)
    Returns a shape-(1,) f32 array (torch: scalar ce + gamma[1] broadcast -> [1]).
    """
    N, C = out_logits.shape
    itemsize = jnp.dtype(out_logits.dtype).itemsize

    # Tile sizing: keep the logits block <= ~4 MiB so 2x double-buffering fits comfortably
    # under v7x's smaller VMEM (and v5e/v6e defaults); rows are a multiple of 8 (sublanes).
    block_budget_bytes = 4 * 1024 * 1024
    rows_fit = max(8, (block_budget_bytes // max(C * itemsize, 1)) // 8 * 8)
    tile_n = int(min(rows_fit, ((N + 7) // 8) * 8))
    num_tiles = int(pl.cdiv(N, tile_n))

    tgt = ce_target.astype(jnp.int32).reshape(N, 1)

    kernel = functools.partial(_costum_loss_kernel, n_rows=N, tile_n=tile_n)

    cost = pl.CostEstimate(
        flops=6 * N * C,
        transcendentals=N * C,
        bytes_accessed=N * C * itemsize + N * 4 + num_tiles * 128 * 4,
    )

    # TODO(synk): for very small C (e.g. C=16) lane utilization is C/128; a lane-dense
    # repack ([N, C] -> [N/k, k*C] with k*C = 128) would speed up the in-VMEM compute.
    # TODO(synk): for vocab-scale C add a second ("arbitrary") grid axis over C with an
    # online logsumexp so the per-step working set stays TILE_N * TILE_C.
    partials = pl.pallas_call(
        kernel,
        out_shape=jax.ShapeDtypeStruct((num_tiles, 1, 128), jnp.float32),
        grid=(num_tiles,),
        in_specs=[
            pl.BlockSpec((tile_n, C), lambda i: (i, 0)),   # logits tile, native dtype
            pl.BlockSpec((tile_n, 1), lambda i: (i, 0)),   # per-tile targets
        ],
        out_specs=pl.BlockSpec((1, 1, 128), lambda i: (i, 0, 0)),
        compiler_params=pltpu.CompilerParams(
            dimension_semantics=("parallel",),
        ),
        cost_estimate=cost,
    )(out_logits, tgt)

    # Tiny scalar epilogue in plain JAX: mean over true N, plus gamma * regularization.
    ce = jnp.sum(partials[:, 0, 0]) / jnp.float32(N)
    loss = ce + jnp.asarray(gamma, jnp.float32) * jnp.asarray(regularization, jnp.float32)
    return loss.reshape(1)


if __name__ == "__main__":
    key = jax.random.PRNGKey(0)
    k1, k2, k3 = jax.random.split(key, 3)

    N, C = 8, 16                               # batch=8, num_classes=16
    logits = jax.random.normal(k1, (N, C), dtype=jnp.float32)
    targets = jax.random.randint(k2, (N,), 0, C, dtype=jnp.int32)
    regularization = jax.random.uniform(k3, (), dtype=jnp.float32)
    gamma = jnp.float32(0.01)                  # nn.Parameter(torch.tensor([0.01]))

    loss = costum_loss(logits, targets, regularization, gamma)
    jax.block_until_ready(loss)

    # pure-JAX reference check
    logp = jax.nn.log_softmax(logits, axis=-1)
    ce_ref = -jnp.mean(logp[jnp.arange(N), targets])
    ref = ce_ref + gamma * regularization
    assert jnp.allclose(loss[0], ref, atol=1e-5, rtol=1e-5), (loss, ref)

    print("KERNEL_OK")
</pallas_src>

<mosaic_0001>
module attributes {stable_mosaic.version = 11 : i64} {
  func.func @_costum_loss_kernel(%arg0: i32, %arg1: memref<8x16xf32, #tpu.memory_space<vmem>>, %arg2: memref<8x1xi32, #tpu.memory_space<vmem>>, %arg3: memref<1x1x128xf32, #tpu.memory_space<vmem>>) attributes {dimension_semantics = [#tpu.dimension_semantics<parallel>], iteration_bounds = array<i64: 1>, scalar_prefetch = 0 : i64, scratch_operands = 0 : i64, tpu.core_type = #tpu.core_type<tc>, window_params = [{transform_indices = @transform_0, window_bounds = array<i64: 8, 16>}, {transform_indices = @transform_1, window_bounds = array<i64: 8, 1>}, {transform_indices = @transform_2, window_bounds = array<i64: 1, 1, 128>}]} {
    %c0 = arith.constant 0 : index
    %c0_0 = arith.constant 0 : index
    %0 = vector.load %arg1[%c0, %c0_0] : memref<8x16xf32, #tpu.memory_space<vmem>>, vector<8x16xf32>
    %c0_1 = arith.constant 0 : index
    %c0_2 = arith.constant 0 : index
    %1 = vector.load %arg2[%c0_1, %c0_2] : memref<8x1xi32, #tpu.memory_space<vmem>>, vector<8x1xi32>
    %cst = arith.constant dense<0xFF800000> : vector<8xf32>
    %2 = vector.multi_reduction <maximumf>, %0, %cst [1] : vector<8x16xf32> to vector<8xf32>
    %3 = vector.shape_cast %2 : vector<8xf32> to vector<8x1xf32>
    %4 = vector.broadcast %3 : vector<8x1xf32> to vector<8x16xf32>
    %5 = arith.subf %0, %4 : vector<8x16xf32>
    %6 = math.exp %5 : vector<8x16xf32>
    %cst_3 = arith.constant dense<0.000000e+00> : vector<8xf32>
    %7 = vector.multi_reduction <add>, %6, %cst_3 [1] : vector<8x16xf32> to vector<8xf32>
    %8 = vector.shape_cast %7 : vector<8xf32> to vector<8x1xf32>
    %9 = math.log %8 : vector<8x1xf32>
    %10 = arith.addf %3, %9 : vector<8x1xf32>
    %11 = tpu.iota {dimensions = array<i32: 1>} : vector<8x16xi32>
    %12 = vector.broadcast %1 : vector<8x1xi32> to vector<8x16xi32>
    %13 = arith.cmpi eq, %11, %12 : vector<8x16xi32>
    %14 = arith.extui %13 : vector<8x16xi1> to vector<8x16xi32>
    %15 = arith.sitofp %14 : vector<8x16xi32> to vector<8x16xf32>
    %16 = arith.mulf %0, %15 : vector<8x16xf32>
    %cst_4 = arith.constant dense<0.000000e+00> : vector<8xf32>
    %17 = vector.multi_reduction <add>, %16, %cst_4 [1] : vector<8x16xf32> to vector<8xf32>
    %18 = vector.shape_cast %17 : vector<8xf32> to vector<8x1xf32>
    %c8_i32 = arith.constant 8 : i32
    %19 = arith.muli %arg0, %c8_i32 : i32
    %20 = tpu.iota {dimensions = array<i32: 0>} : vector<8x1xi32>
    %21 = vector.broadcast %19 : i32 to vector<8x1xi32>
    %22 = arith.addi %21, %20 : vector<8x1xi32>
    %c8_i32_5 = arith.constant 8 : i32
    %23 = vector.broadcast %c8_i32_5 : i32 to vector<8x1xi32>
    %24 = arith.cmpi slt, %22, %23 : vector<8x1xi32>
    %25 = arith.subf %10, %18 : vector<8x1xf32>
    %cst_6 = arith.constant 0.000000e+00 : f32
    %26 = vector.broadcast %cst_6 : f32 to vector<8x1xf32>
    %27 = arith.select %24, %25, %26 : vector<8x1xi1>, vector<8x1xf32>
    %28 = vector.shape_cast %27 : vector<8x1xf32> to vector<1x8x1xf32>
    %cst_7 = arith.constant dense<0.000000e+00> : vector<1xf32>
    %29 = vector.multi_reduction <add>, %28, %cst_7 [1, 2] : vector<1x8x1xf32> to vector<1xf32>
    %30 = vector.shape_cast %29 : vector<1xf32> to vector<1x1x1xf32>
    %31 = vector.extract %30[0, 0, 0] : f32 from vector<1x1x1xf32>
    %32 = vector.broadcast %31 : f32 to vector<1x1x128xf32>
    %c0_8 = arith.constant 0 : index
    %c0_9 = arith.constant 0 : index
    %c0_10 = arith.constant 0 : index
    %33 = vector.load %arg3[%c0_8, %c0_9, %c0_10] : memref<1x1x128xf32, #tpu.memory_space<vmem>>, vector<1x1x128xf32>
    tpu.vector_store %arg3[%c0_8, %c0_9, %c0_10], %32 {strides = array<i32>} : memref<1x1x128xf32, #tpu.memory_space<vmem>>, vector<1x1x128xf32>,
    return
  }
  func.func @transform_0(%arg0: i32) -> (i32, i32) {
    %c0_i32 = arith.constant 0 : i32
    %c0_i32_0 = arith.constant 0 : i32
    return %arg0, %c0_i32 : i32, i32
  }
  func.func @transform_1(%arg0: i32) -> (i32, i32) {
    %c0_i32 = arith.constant 0 : i32
    %c0_i32_0 = arith.constant 0 : i32
    return %arg0, %c0_i32 : i32, i32
  }
  func.func @transform_2(%arg0: i32) -> (i32, i32, i32) {
    %c0_i32 = arith.constant 0 : i32
    %c0_i32_0 = arith.constant 0 : i32
    %c0_i32_1 = arith.constant 0 : i32
    return %arg0, %c0_i32, %c0_i32_0 : i32, i32, i32
  }
}

</mosaic_0001>

<bundles_post_ra>
// kernel: tpu_custom_call.1
= control target key start
LH: loop header
LB: loop body
LE: loop exit
PB: predicated region body
PF: predicated region fallthrough
CT: control target
= control target key end

     0   :  { %vm14_vm0 = vcmask 130048   ;;  %s148_s0 = inlined_call_operand.vmem [shape: f32[8,16], index: 0, kind: input, shape index: {}]   ;;  %s149_s1 = inlined_call_operand.vmem [shape: s32[8,1], index: 1, kind: input, shape index: {}]   ;;  %s150_s2 = inlined_call_operand.hbm [shape: f32[1,1,128], index: 2, kind: output, shape index: {}]  }
   0x1   :  { %v12_v0 = vld [vmem:[%s148_s0] sm:$0xff] }
   0x2   :  { %7 = vsyncpa [#allocation3], 0  ;;  %v15_v1 = vsel %vm14_vm0, %v12_v0, -inf  ;;  %v109_v2 = vmov 0   ;;  %v13_v3 = vld [vmem:[%s149_s1] sm:$0xff]  ;;  %v27_v6 = vlaneseq  ;;  %v110_v10 = vmov 0.0  }
   0x3   :  { %80 = vset.pattern.permute.xlu0 %v109_v2  ;;  %vm47_vm2 = vcmask 7168   ;;  %s111_s0 = smov [#allocation2]  }
   0x4   :  { %16 = vmax.xlane.f32.xlu0 %v15_v1  ;;  %v28_v8 = vand.u32 127, %v27_v6  ;;  %s66_s1 = sshll.u32 %s111_s0, 4  ;;  %s67_s1 = int_to_ptr.vmem [resolvable:$true] %s66_s1 }
   0x5   :  { %s85_s14 = scalar_lea.vmem %s67_s1, 16  ;;  %s89_s15 = scalar_lea.vmem %s67_s1, 32 }
   0x6   :  { %p86_p0 = scmp.ne.s32.totalorder %s67_s1, %s85_s14  ;;  %p90_p1 = scmp.lt.s32.totalorder %s67_s1, %s67_s1 }
   0x7   :  { %p91_p2 = scmp.lt.s32.totalorder %s89_s15, %s85_s14 }
   0x9   :  { %p92_p3 = por %p91_p2, %p90_p1 }
   0xb   :  { %p93_p4 = pnand %p92_p3, %p86_p0 }
  0x1a   :  { %30 = vperm.xlu0 %80, %v13_v3  }
  0x91   :  { %v17_v4 = vpop.xlane.xlu0 %16 }
  0x92   :  { %v18_v5 = vsub.f32 %v12_v0, %v17_v4 }
  0x94   :  { %v19_v7 = vmul.f32 1.442695, %v18_v5 }
  0x96   :  { %81 = vpow2.f32 %v19_v7 }
  0x99   :  { %v31_v9 = vpop.permute.xlu0 %30 }
  0x9a   :  { %vm32_vm1 = vcmp.eq.s32.totalorder %v28_v8, %v31_v9 }
  0x9b   :  { %v74_v11 = vsel %vm32_vm1, 1.0, %v110_v10 }
  0x9c   :  { %v35_v12 = vmul.f32 %v74_v11, %v12_v0 }
  0x9e   :  { %v36_v15 = vsel %vm14_vm0, %v35_v12, 0.0 }
  0xa0   :  { %v82_v13 = vpop.eup %81 }
  0xa1   :  { %v21_v14 = vsel %vm14_vm0, %v82_v13, 0.0 }
  0xa2   :  { %22 = vadd.xlane.f32.xlu1 %v21_v14 }
  0xa6   :  { %37 = vadd.xlane.f32.xlu1 %v36_v15 }
 0x12f   :  { %v23_v16 = vpop.xlane.xlu1 %22 }
 0x130   :  { %83 = vlog2.f32 %v23_v16 }
 0x133   :  { %v38_v19 = vpop.xlane.xlu1 %37 }
 0x13a   :  { %v84_v17 = vpop.eup %83 }
 0x13b   :  { %v25_v18 = vmul.f32 0.6931472, %v84_v17 }
 0x13d   :  { %v26_v20 = vadd.f32 %v25_v18, %v17_v4 }
 0x13f   :  { %v45_v21 = vsub.f32 %v26_v20, %v38_v19 }
 0x141   :  { %v48_v22 = vsel %vm47_vm2, %v45_v21, 0.0 }
 0x142   :  { %49 = vadd.xlane.f32.xlu1 %v48_v22 }
 0x1cf   :  { %v50_v23 = vpop.xlane.xlu1 %49 }
 0x1d0   :  { %v51_v24 = vrot.slane %v50_v23, 4 }
 0x1d2   :  { %v52_v25 = vadd.f32 %v51_v24, %v50_v23 }
 0x1d4   :  { %v53_v26 = vrot.slane %v52_v25, 2 }
 0x1d6   :  { %v54_v27 = vadd.f32 %v53_v26, %v52_v25 }
 0x1d8   :  { %v55_v28 = vrot.slane %v54_v27, 1 }
 0x1da   :  { %v56_v29 = vadd.f32 %v55_v28, %v54_v27 }
 0x1dc   :  { %75 = vpush %v56_v29 }
 0x20d   :  { %s76_s13 = spop %75 }
 0x20e   :  { %v58_v30 = vstv %s76_s13 }
 0x20f   :  { %59 = vst [vmem:[#allocation2] sm:$0x1] %v58_v30 }
 0x210   :  { %96 = shalt.err (!%p93_p4)
}
 0x211   :  { %s97_s18 = scalar_lea.hbm %s150_s2, 16 }
 0x212   :  { %p98_p5 = scmp.ne.s32.totalorder %s150_s2, %s97_s18  ;;  %p101_p6 = scmp.lt.u32.totalorder %s97_s18, %s150_s2 }
 0x214   :  { %p103_p7 = pnand %p101_p6, %p98_p5 }
 0x216   :  { %106 = shalt.err (!%p103_p7)
}
 0x217   :  { %69 = dma.vmem_to_hbm [thread:$0]  %s67_s1, 16, %s150_s2, [#allocation3]  }
 0x218   :  { %107 = dma.done.wait [#allocation3], 16  }
 0x219   :  { %108 = vsyncadd [#allocation3], 4294967280 }
 0x21a   :  { %73 = vsyncpa [#allocation3], 1 }

</bundles_post_ra>
